<compile_context>
chip_gen: v6e
topology: v6e:2x2x1
jax: 0.10.0
libtpu: 0.0.40
codegen_flags: <defaults>
</compile_context>

<pallas_src>
import jax
import jax.numpy as jnp
from jax.experimental import pallas as pl
from jax.experimental.pallas import tpu as pltpu

MiB = 1024 * 1024


# ---------------------------------------------------------------------------
# In-kernel helpers (traced inside the Pallas body) -- all fp32 on the VPU.
# ---------------------------------------------------------------------------
def _layernorm(x, w, b, eps=1e-5):
    # nn.LayerNorm(input_dim): normalize over last dim, affine weight/bias.
    mu = jnp.mean(x, axis=-1, keepdims=True)
    var = jnp.maximum(jnp.mean(x * x, axis=-1, keepdims=True) - mu * mu, 0.0)
    return (x - mu) * jax.lax.rsqrt(var + eps) * w + b


def _gelu(x):
    # nn.GELU() default = exact erf-based GELU (kept exact to match PyTorch).
    return 0.5 * x * (1.0 + jax.lax.erf(x * jnp.float32(0.7071067811865476)))


def _mixer_layer(x, sp, b3, w1, w2, w3, w4):
    """One MixerFusion layer applied to a fp32 (tm, D) activation tile.

    sp rows: 0 ln1_w, 1 ln1_b, 2 b1, 3 b2, 4 ln2_w, 5 ln2_b, 6 b4.
    """
    mm = w1.dtype  # matmul operand dtype (bf16 by default, f32 optional)
    ln1_w, ln1_b, b1, b2 = sp[0], sp[1], sp[2], sp[3]
    ln2_w, ln2_b, b4 = sp[4], sp[5], sp[6]

    # token mixer: x = x + Linear(GELU(Linear(LayerNorm(x))))      (D -> D -> D)
    h = _layernorm(x, ln1_w, ln1_b)
    h = jnp.dot(h.astype(mm), w1, preferred_element_type=jnp.float32) + b1
    h = _gelu(h)
    h = jnp.dot(h.astype(mm), w2, preferred_element_type=jnp.float32) + b2
    x = x + h

    # channel mixer: x = x + Linear(GELU(Linear(LayerNorm(x))))    (D -> H -> D)
    h = _layernorm(x, ln2_w, ln2_b)
    h = jnp.dot(h.astype(mm), w3, preferred_element_type=jnp.float32) + b3
    h = _gelu(h)
    h = jnp.dot(h.astype(mm), w4, preferred_element_type=jnp.float32) + b4
    return x + h


# ---------------------------------------------------------------------------
# Kernel bodies
# ---------------------------------------------------------------------------
def mixer_resident_kernel(x_ref, small_ref, b3_ref,
                          w1_ref, w2_ref, w3_ref, w4_ref, o_ref):
    """Weights-resident path: grid = (row_tiles,).  All layers looped in-kernel."""
    num_layers = w1_ref.shape[0]
    x = x_ref[...].astype(jnp.float32)

    def body(l, x):
        return _mixer_layer(x, small_ref[l], b3_ref[l],
                            w1_ref[l], w2_ref[l], w3_ref[l], w4_ref[l])

    x = jax.lax.fori_loop(0, num_layers, body, x, unroll=(num_layers <= 8))
    o_ref[...] = x.astype(o_ref.dtype)


def _make_stream_kernel(acc_in_out):
    """Weight-streaming fallback: grid = (row_tiles, layers).

    If acc_in_out, the residual stream accumulates directly in o_ref (its
    block index is constant across the layer axis -> VMEM-resident); otherwise
    a fp32 VMEM scratch is used and o_ref is written once at the last layer.
    """
    def kernel(x_ref, small_ref, b3_ref,
               w1_ref, w2_ref, w3_ref, w4_ref, o_ref, *scratch):
        layer = pl.program_id(1)
        acc_ref = o_ref if acc_in_out else scratch[0]

        @pl.when(layer == 0)
        def _():
            acc_ref[...] = x_ref[...].astype(acc_ref.dtype)

        x = acc_ref[...].astype(jnp.float32)
        x = _mixer_layer(x, small_ref[0], b3_ref[0],
                         w1_ref[0], w2_ref[0], w3_ref[0], w4_ref[0])
        acc_ref[...] = x.astype(acc_ref.dtype)

        if not acc_in_out:
            @pl.when(layer == pl.num_programs(1) - 1)
            def _():
                o_ref[...] = x.astype(o_ref.dtype)

    return kernel


# ---------------------------------------------------------------------------
# Host-side helpers
# ---------------------------------------------------------------------------
def _round_up(x, m):
    return ((x + m - 1) // m) * m


def _vmem_budget_bytes():
    """Generation-aware VMEM budget; conservative fallback if query fails."""
    cap = None
    try:
        cap = getattr(pltpu.get_tpu_info(), "vmem_capacity_bytes", None)
    except Exception:
        cap = None
    if not cap:
        return 55 * MiB                              # safe even on v7x (64 MiB)
    if cap <= 64 * MiB:
        return max(16 * MiB, min(55 * MiB, cap - 8 * MiB))   # v7x-class
    return min(100 * MiB, cap - 24 * MiB)                    # v5e / v6e (128 MiB)


def _resident_vmem_bytes(tm, L, D, H, in_b, out_b, w_b):
    weights = 2 * L * (2 * D * D + 2 * D * H) * w_b   # x2: pipeline buffering
    small = 2 * L * (8 * D + H) * 4
    act = tm * D * (in_b + out_b) * 2                 # double-buffered x / out
    temps = 4 * tm * max(D, H) * 4                    # fp32 intermediates headroom
    return weights + small + act + temps


def _stream_vmem_bytes(tm, D, H, in_b, out_b, w_b, need_scratch):
    weights = 2 * (2 * D * D + 2 * D * H) * w_b       # one layer, double-buffered
    small = 2 * (8 * D + H) * 4
    act = tm * D * (in_b + out_b) * 2
    scratch = tm * D * 4 if need_scratch else 0
    temps = 4 * tm * max(D, H) * 4
    return weights + small + act + scratch + temps


def _pick_tm(M, tm_init, fits):
    tm = max(8, _round_up(min(tm_init, _round_up(M, 8)), 8))
    while tm > 8 and not fits(tm):
        tm = max(8, _round_up(tm // 2, 8))
    # Keep at least two row tiles when possible (both v7x TensorCores get work).
    if M > 8:
        tm = min(tm, max(8, _round_up(-(-M // 2), 8)))
    return tm


def _pack_params(layer_params, matmul_dtype):
    """Stack per-layer params along L; pack the 8 small fp32 vectors into 2 arrays."""
    def row(k):
        return jnp.stack(
            [jnp.asarray(p[k], jnp.float32).reshape(1, -1) for p in layer_params],
            axis=0)

    small = jnp.concatenate(
        [row("ln1_w"), row("ln1_b"), row("b1"), row("b2"),
         row("ln2_w"), row("ln2_b"), row("b4")], axis=1)           # (L, 7, D) f32
    b3 = row("b3")                                                 # (L, 1, H) f32

    def w(k):
        return jnp.stack([jnp.asarray(p[k]) for p in layer_params],
                         axis=0).astype(matmul_dtype)

    # Weights here are stored (in_features, out_features); a real PyTorch
    # checkpoint ((out, in) with x @ W^T) would be transposed once on the host.
    return small, b3, w("w1"), w("w2"), w("w3"), w("w4")


def mixer_fusion_forward(x, layer_params, *, tm=None,
                         matmul_dtype=jnp.bfloat16,
                         weights_resident=None,
                         vmem_budget_bytes=None,
                         donate_input=True):
    """x: (B, S, D).  layer_params: list of per-layer parameter dicts."""
    B, S, D = x.shape
    L = len(layer_params)
    H = layer_params[0]["w3"].shape[-1]
    M = B * S
    x2d = x.reshape(M, D)

    in_b = out_b = x.dtype.itemsize
    w_b = jnp.dtype(matmul_dtype).itemsize
    budget = int(vmem_budget_bytes) if vmem_budget_bytes else _vmem_budget_bytes()

    # --- resident vs streaming decision (resident when stacked weights fit).
    if weights_resident is None:
        weights_resident = _resident_vmem_bytes(8, L, D, H, in_b, out_b, w_b) <= budget
    if weights_resident:
        fits = lambda t: _resident_vmem_bytes(t, L, D, H, in_b, out_b, w_b) <= budget
    else:
        need_scratch = x.dtype != jnp.float32
        fits = lambda t: _stream_vmem_bytes(t, D, H, in_b, out_b, w_b,
                                            need_scratch) <= budget

    tm = _pick_tm(M, tm if tm else 512, fits)
    M_pad = _round_up(M, tm)
    if M_pad != M:
        x2d = jnp.pad(x2d, ((0, M_pad - M), (0, 0)))
    num_tiles = M_pad // tm

    packed = _pack_params(layer_params, matmul_dtype)   # small, b3, w1, w2, w3, w4

    flops = 2 * M_pad * (2 * D * D + 2 * D * H) * L
    w_bytes_once = sum(int(a.size) * a.dtype.itemsize for a in packed)
    bytes_accessed = (M_pad * D * (in_b + out_b)
                      + w_bytes_once * (1 if weights_resident else num_tiles))
    cost = pl.CostEstimate(flops=flops,
                           transcendentals=M_pad * (D + H) * L,
                           bytes_accessed=bytes_accessed)

    if weights_resident:
        kernel = mixer_resident_kernel
        grid = (num_tiles,)
        x_spec = pl.BlockSpec((tm, D), lambda i: (i, 0))
        out_spec = pl.BlockSpec((tm, D), lambda i: (i, 0))
        param_specs = [pl.BlockSpec(a.shape, lambda i, nd=a.ndim: (0,) * nd)
                       for a in packed]
        scratch_shapes = []
        dims = ("parallel",)
    else:
        acc_in_out = x.dtype == jnp.float32
        kernel = _make_stream_kernel(acc_in_out)
        grid = (num_tiles, L)                     # rows outer/parallel, layers inner
        x_spec = pl.BlockSpec((tm, D), lambda i, l: (i, 0))
        out_spec = pl.BlockSpec((tm, D), lambda i, l: (i, 0))
        param_specs = [pl.BlockSpec((1,) + a.shape[1:],
                                    lambda i, l, nd=a.ndim: (l,) + (0,) * (nd - 1))
                       for a in packed]
        scratch_shapes = [] if acc_in_out else [pltpu.VMEM((tm, D), jnp.float32)]
        dims = ("parallel", "arbitrary")

    out2d = pl.pallas_call(
        kernel,
        out_shape=jax.ShapeDtypeStruct((M_pad, D), x.dtype),
        grid_spec=pltpu.PrefetchScalarGridSpec(
            num_scalar_prefetch=0,
            grid=grid,
            in_specs=[x_spec] + param_specs,
            out_specs=out_spec,
            scratch_shapes=scratch_shapes,
        ),
        compiler_params=pltpu.CompilerParams(
            dimension_semantics=dims,
            vmem_limit_bytes=int(budget)),
        cost_estimate=cost,
        input_output_aliases=({0: 0} if donate_input else {}),
    )(x2d, *packed)

    return out2d[:M].reshape(B, S, D)


# ---------------------------------------------------------------------------
# Deterministic parameter construction (synthetic init, shapes from __init__)
# ---------------------------------------------------------------------------
def init_params(key, input_dim, hidden_dim, num_layers=1, scale=0.05):
    params = []
    for _ in range(num_layers):
        keys = jax.random.split(key, 9)
        key = keys[0]
        p = {
            # token mixer: LayerNorm(D), Linear(D, D), GELU, Linear(D, D)
            "ln1_w": jnp.ones((1, input_dim), jnp.float32),
            "ln1_b": jnp.zeros((1, input_dim), jnp.float32),
            "w1": scale * jax.random.normal(keys[1], (input_dim, input_dim), jnp.float32),
            "b1": scale * jax.random.normal(keys[2], (1, input_dim), jnp.float32),
            "w2": scale * jax.random.normal(keys[3], (input_dim, input_dim), jnp.float32),
            "b2": scale * jax.random.normal(keys[4], (1, input_dim), jnp.float32),
            # channel mixer: LayerNorm(D), Linear(D, H), GELU, Linear(H, D)
            "ln2_w": jnp.ones((1, input_dim), jnp.float32),
            "ln2_b": jnp.zeros((1, input_dim), jnp.float32),
            "w3": scale * jax.random.normal(keys[5], (input_dim, hidden_dim), jnp.float32),
            "b3": scale * jax.random.normal(keys[6], (1, hidden_dim), jnp.float32),
            "w4": scale * jax.random.normal(keys[7], (hidden_dim, input_dim), jnp.float32),
            "b4": scale * jax.random.normal(keys[8], (1, input_dim), jnp.float32),
        }
        params.append(p)
    return params


# Plain-JAX fp32 reference (mirrors the PyTorch forward) for correctness.
def reference_forward(x, layer_params):
    def ln(v, w, b):
        mu = jnp.mean(v, axis=-1, keepdims=True)
        var = jnp.mean(jnp.square(v - mu), axis=-1, keepdims=True)
        return (v - mu) * jax.lax.rsqrt(var + 1e-5) * w + b

    gelu = lambda v: 0.5 * v * (1.0 + jax.lax.erf(v / jnp.sqrt(2.0)))
    for p in layer_params:
        h = ln(x, p["ln1_w"][0], p["ln1_b"][0])
        h = gelu(h @ p["w1"] + p["b1"][0]) @ p["w2"] + p["b2"][0]
        x = x + h
        h = ln(x, p["ln2_w"][0], p["ln2_b"][0])
        h = gelu(h @ p["w3"] + p["b3"][0]) @ p["w4"] + p["b4"][0]
        x = x + h
    return x


if __name__ == "__main__":
    # Small demo shapes (real configs should use D, H multiples of 128/256).
    B, S, D, H = 2, 8, 32, 64          # batch=2, seq=8, input_dim=32, hidden_dim=64
    num_layers = 2

    key = jax.random.PRNGKey(0)
    kx, kp = jax.random.split(key)
    x = jax.random.normal(kx, (B, S, D), jnp.float32)
    params = init_params(kp, D, H, num_layers)

    ref = reference_forward(x, params)

    # 1) Exact fp32-matmul path, weights-resident kernel (default at these shapes).
    out_f32 = mixer_fusion_forward(x, params, matmul_dtype=jnp.float32,
                                   donate_input=False)
    out_f32 = jax.block_until_ready(out_f32)
    assert out_f32.shape == (B, S, D)
    assert jnp.allclose(out_f32, ref, atol=1e-5, rtol=1e-5), "resident f32 mismatch"

    # 2) Exact fp32-matmul path, forced weight-streaming fallback kernel.
    out_stream = mixer_fusion_forward(x, params, matmul_dtype=jnp.float32,
                                      weights_resident=False, donate_input=False)
    out_stream = jax.block_until_ready(out_stream)
    assert jnp.allclose(out_stream, ref, atol=1e-5, rtol=1e-5), "streaming f32 mismatch"

    # 3) Optimized bf16-operand path (fp32 accumulation); donating call goes last.
    out_bf16 = mixer_fusion_forward(x, params)
    out_bf16 = jax.block_until_ready(out_bf16)
    assert out_bf16.shape == (B, S, D)
    assert jnp.allclose(out_bf16, ref, atol=3e-2, rtol=3e-2), "bf16 path mismatch"

    print("KERNEL_OK")
</pallas_src>

<mosaic_0001>
module attributes {stable_mosaic.version = 11 : i64} {
  func.func @mixer_resident_kernel(%arg0: i32, %arg1: memref<8x32xf32, #tpu.memory_space<vmem>>, %arg2: memref<2x7x32xf32, #tpu.memory_space<vmem>>, %arg3: memref<2x1x64xf32, #tpu.memory_space<vmem>>, %arg4: memref<2x32x32xf32, #tpu.memory_space<vmem>>, %arg5: memref<2x32x32xf32, #tpu.memory_space<vmem>>, %arg6: memref<2x32x64xf32, #tpu.memory_space<vmem>>, %arg7: memref<2x64x32xf32, #tpu.memory_space<vmem>>, %arg8: memref<8x32xf32, #tpu.memory_space<vmem>>) attributes {dimension_semantics = [#tpu.dimension_semantics<parallel>], iteration_bounds = array<i64: 2>, scalar_prefetch = 0 : i64, scratch_operands = 0 : i64, tpu.core_type = #tpu.core_type<tc>, window_params = [{transform_indices = @transform_0, window_bounds = array<i64: 8, 32>}, {pipeline_mode = #tpu.pipeline_mode<synchronous>, transform_indices = @transform_1, window_bounds = array<i64: 2, 7, 32>}, {pipeline_mode = #tpu.pipeline_mode<synchronous>, transform_indices = @transform_2, window_bounds = array<i64: 2, 1, 64>}, {pipeline_mode = #tpu.pipeline_mode<synchronous>, transform_indices = @transform_3, window_bounds = array<i64: 2, 32, 32>}, {pipeline_mode = #tpu.pipeline_mode<synchronous>, transform_indices = @transform_4, window_bounds = array<i64: 2, 32, 32>}, {pipeline_mode = #tpu.pipeline_mode<synchronous>, transform_indices = @transform_5, window_bounds = array<i64: 2, 32, 64>}, {pipeline_mode = #tpu.pipeline_mode<synchronous>, transform_indices = @transform_6, window_bounds = array<i64: 2, 64, 32>}, {transform_indices = @transform_7, window_bounds = array<i64: 8, 32>}]} {
    %c0 = arith.constant 0 : index
    %c0_0 = arith.constant 0 : index
    %0 = vector.load %arg1[%c0, %c0_0] : memref<8x32xf32, #tpu.memory_space<vmem>>, vector<8x32xf32>
    %c0_i32 = arith.constant 0 : i32
    %1 = arith.index_cast %c0_i32 : i32 to index
    %c0_1 = arith.constant 0 : index
    %c0_2 = arith.constant 0 : index
    %2 = vector.load %arg2[%1, %c0_1, %c0_2] : memref<2x7x32xf32, #tpu.memory_space<vmem>>, vector<1x7x32xf32>
    %3 = vector.shape_cast %2 : vector<1x7x32xf32> to vector<7x32xf32>
    %4 = arith.index_cast %c0_i32 : i32 to index
    %c0_3 = arith.constant 0 : index
    %c0_4 = arith.constant 0 : index
    %5 = vector.load %arg3[%4, %c0_3, %c0_4] : memref<2x1x64xf32, #tpu.memory_space<vmem>>, vector<1x1x64xf32>
    %6 = vector.shape_cast %5 : vector<1x1x64xf32> to vector<1x64xf32>
    %7 = arith.index_cast %c0_i32 : i32 to index
    %c0_5 = arith.constant 0 : index
    %c0_6 = arith.constant 0 : index
    %8 = vector.load %arg4[%7, %c0_5, %c0_6] : memref<2x32x32xf32, #tpu.memory_space<vmem>>, vector<1x32x32xf32>
    %9 = vector.shape_cast %8 : vector<1x32x32xf32> to vector<32x32xf32>
    %10 = arith.index_cast %c0_i32 : i32 to index
    %c0_7 = arith.constant 0 : index
    %c0_8 = arith.constant 0 : index
    %11 = vector.load %arg5[%10, %c0_7, %c0_8] : memref<2x32x32xf32, #tpu.memory_space<vmem>>, vector<1x32x32xf32>
    %12 = vector.shape_cast %11 : vector<1x32x32xf32> to vector<32x32xf32>
    %13 = arith.index_cast %c0_i32 : i32 to index
    %c0_9 = arith.constant 0 : index
    %c0_10 = arith.constant 0 : index
    %14 = vector.load %arg6[%13, %c0_9, %c0_10] : memref<2x32x64xf32, #tpu.memory_space<vmem>>, vector<1x32x64xf32>
    %15 = vector.shape_cast %14 : vector<1x32x64xf32> to vector<32x64xf32>
    %16 = arith.index_cast %c0_i32 : i32 to index
    %c0_11 = arith.constant 0 : index
    %c0_12 = arith.constant 0 : index
    %17 = vector.load %arg7[%16, %c0_11, %c0_12] : memref<2x64x32xf32, #tpu.memory_space<vmem>>, vector<1x64x32xf32>
    %18 = vector.shape_cast %17 : vector<1x64x32xf32> to vector<64x32xf32>
    %19 = vector.extract_strided_slice %3 {offsets = [0, 0], sizes = [1, 32], strides = [1, 1]} : vector<7x32xf32> to vector<1x32xf32>
    %20 = vector.shape_cast %19 : vector<1x32xf32> to vector<32xf32>
    %21 = vector.extract_strided_slice %3 {offsets = [1, 0], sizes = [1, 32], strides = [1, 1]} : vector<7x32xf32> to vector<1x32xf32>
    %22 = vector.shape_cast %21 : vector<1x32xf32> to vector<32xf32>
    %23 = vector.extract_strided_slice %3 {offsets = [2, 0], sizes = [1, 32], strides = [1, 1]} : vector<7x32xf32> to vector<1x32xf32>
    %24 = vector.shape_cast %23 : vector<1x32xf32> to vector<32xf32>
    %25 = vector.extract_strided_slice %3 {offsets = [3, 0], sizes = [1, 32], strides = [1, 1]} : vector<7x32xf32> to vector<1x32xf32>
    %26 = vector.shape_cast %25 : vector<1x32xf32> to vector<32xf32>
    %27 = vector.extract_strided_slice %3 {offsets = [4, 0], sizes = [1, 32], strides = [1, 1]} : vector<7x32xf32> to vector<1x32xf32>
    %28 = vector.shape_cast %27 : vector<1x32xf32> to vector<32xf32>
    %29 = vector.extract_strided_slice %3 {offsets = [5, 0], sizes = [1, 32], strides = [1, 1]} : vector<7x32xf32> to vector<1x32xf32>
    %30 = vector.shape_cast %29 : vector<1x32xf32> to vector<32xf32>
    %31 = vector.extract_strided_slice %3 {offsets = [6, 0], sizes = [1, 32], strides = [1, 1]} : vector<7x32xf32> to vector<1x32xf32>
    %32 = vector.shape_cast %31 : vector<1x32xf32> to vector<32xf32>
    %cst = arith.constant dense<0.000000e+00> : vector<8xf32>
    %33 = vector.multi_reduction <add>, %0, %cst [1] : vector<8x32xf32> to vector<8xf32>
    %34 = vector.shape_cast %33 : vector<8xf32> to vector<8x1xf32>
    %cst_13 = arith.constant 3.200000e+01 : f32
    %35 = vector.broadcast %cst_13 : f32 to vector<8x1xf32>
    %36 = arith.divf %34, %35 : vector<8x1xf32>
    %37 = arith.mulf %0, %0 : vector<8x32xf32>
    %cst_14 = arith.constant dense<0.000000e+00> : vector<8xf32>
    %38 = vector.multi_reduction <add>, %37, %cst_14 [1] : vector<8x32xf32> to vector<8xf32>
    %39 = vector.shape_cast %38 : vector<8xf32> to vector<8x1xf32>
    %cst_15 = arith.constant 3.200000e+01 : f32
    %40 = vector.broadcast %cst_15 : f32 to vector<8x1xf32>
    %41 = arith.divf %39, %40 : vector<8x1xf32>
    %42 = arith.mulf %36, %36 : vector<8x1xf32>
    %43 = arith.subf %41, %42 : vector<8x1xf32>
    %cst_16 = arith.constant 0.000000e+00 : f32
    %44 = vector.broadcast %cst_16 : f32 to vector<8x1xf32>
    %45 = arith.maximumf %43, %44 : vector<8x1xf32>
    %46 = vector.broadcast %36 : vector<8x1xf32> to vector<8x32xf32>
    %47 = arith.subf %0, %46 : vector<8x32xf32>
    %cst_17 = arith.constant 9.99999974E-6 : f32
    %48 = vector.broadcast %cst_17 : f32 to vector<8x1xf32>
    %49 = arith.addf %45, %48 : vector<8x1xf32>
    %50 = math.rsqrt %49 : vector<8x1xf32>
    %51 = vector.broadcast %50 : vector<8x1xf32> to vector<8x32xf32>
    %52 = arith.mulf %47, %51 : vector<8x32xf32>
    %53 = vector.shape_cast %20 : vector<32xf32> to vector<1x32xf32>
    %54 = vector.broadcast %53 : vector<1x32xf32> to vector<8x32xf32>
    %55 = arith.mulf %52, %54 : vector<8x32xf32>
    %56 = vector.shape_cast %22 : vector<32xf32> to vector<1x32xf32>
    %57 = vector.broadcast %56 : vector<1x32xf32> to vector<8x32xf32>
    %58 = arith.addf %55, %57 : vector<8x32xf32>
    %cst_18 = arith.constant dense<0.000000e+00> : vector<8x32xf32>
    %59 = tpu.matmul %58, %9, %cst_18 {dimension_numbers = #tpu.dot_dimension_numbers<[1], [0], [0], [1], [0, 0, 1, 1], [], []>} : vector<8x32xf32>, vector<32x32xf32>, vector<8x32xf32> -> vector<8x32xf32>
    %60 = vector.shape_cast %24 : vector<32xf32> to vector<1x32xf32>
    %61 = vector.broadcast %60 : vector<1x32xf32> to vector<8x32xf32>
    %62 = arith.addf %59, %61 : vector<8x32xf32>
    %cst_19 = arith.constant 5.000000e-01 : f32
    %63 = vector.broadcast %cst_19 : f32 to vector<8x32xf32>
    %64 = arith.mulf %63, %62 : vector<8x32xf32>
    %cst_20 = arith.constant 0.707106769 : f32
    %65 = vector.broadcast %cst_20 : f32 to vector<8x32xf32>
    %66 = arith.mulf %62, %65 : vector<8x32xf32>
    %67 = math.erf %66 : vector<8x32xf32>
    %cst_21 = arith.constant 1.000000e+00 : f32
    %68 = vector.broadcast %cst_21 : f32 to vector<8x32xf32>
    %69 = arith.addf %68, %67 : vector<8x32xf32>
    %70 = arith.mulf %64, %69 : vector<8x32xf32>
    %cst_22 = arith.constant dense<0.000000e+00> : vector<8x32xf32>
    %71 = tpu.matmul %70, %12, %cst_22 {dimension_numbers = #tpu.dot_dimension_numbers<[1], [0], [0], [1], [0, 0, 1, 1], [], []>} : vector<8x32xf32>, vector<32x32xf32>, vector<8x32xf32> -> vector<8x32xf32>
    %72 = vector.shape_cast %26 : vector<32xf32> to vector<1x32xf32>
    %73 = vector.broadcast %72 : vector<1x32xf32> to vector<8x32xf32>
    %74 = arith.addf %71, %73 : vector<8x32xf32>
    %75 = arith.addf %0, %74 : vector<8x32xf32>
    %cst_23 = arith.constant dense<0.000000e+00> : vector<8xf32>
    %76 = vector.multi_reduction <add>, %75, %cst_23 [1] : vector<8x32xf32> to vector<8xf32>
    %77 = vector.shape_cast %76 : vector<8xf32> to vector<8x1xf32>
    %cst_24 = arith.constant 3.200000e+01 : f32
    %78 = vector.broadcast %cst_24 : f32 to vector<8x1xf32>
    %79 = arith.divf %77, %78 : vector<8x1xf32>
    %80 = arith.mulf %75, %75 : vector<8x32xf32>
    %cst_25 = arith.constant dense<0.000000e+00> : vector<8xf32>
    %81 = vector.multi_reduction <add>, %80, %cst_25 [1] : vector<8x32xf32> to vector<8xf32>
    %82 = vector.shape_cast %81 : vector<8xf32> to vector<8x1xf32>
    %cst_26 = arith.constant 3.200000e+01 : f32
    %83 = vector.broadcast %cst_26 : f32 to vector<8x1xf32>
    %84 = arith.divf %82, %83 : vector<8x1xf32>
    %85 = arith.mulf %79, %79 : vector<8x1xf32>
    %86 = arith.subf %84, %85 : vector<8x1xf32>
    %cst_27 = arith.constant 0.000000e+00 : f32
    %87 = vector.broadcast %cst_27 : f32 to vector<8x1xf32>
    %88 = arith.maximumf %86, %87 : vector<8x1xf32>
    %89 = vector.broadcast %79 : vector<8x1xf32> to vector<8x32xf32>
    %90 = arith.subf %75, %89 : vector<8x32xf32>
    %cst_28 = arith.constant 9.99999974E-6 : f32
    %91 = vector.broadcast %cst_28 : f32 to vector<8x1xf32>
    %92 = arith.addf %88, %91 : vector<8x1xf32>
    %93 = math.rsqrt %92 : vector<8x1xf32>
    %94 = vector.broadcast %93 : vector<8x1xf32> to vector<8x32xf32>
    %95 = arith.mulf %90, %94 : vector<8x32xf32>
    %96 = vector.shape_cast %28 : vector<32xf32> to vector<1x32xf32>
    %97 = vector.broadcast %96 : vector<1x32xf32> to vector<8x32xf32>
    %98 = arith.mulf %95, %97 : vector<8x32xf32>
    %99 = vector.shape_cast %30 : vector<32xf32> to vector<1x32xf32>
    %100 = vector.broadcast %99 : vector<1x32xf32> to vector<8x32xf32>
    %101 = arith.addf %98, %100 : vector<8x32xf32>
    %cst_29 = arith.constant dense<0.000000e+00> : vector<8x64xf32>
    %102 = tpu.matmul %101, %15, %cst_29 {dimension_numbers = #tpu.dot_dimension_numbers<[1], [0], [0], [1], [0, 0, 1, 1], [], []>} : vector<8x32xf32>, vector<32x64xf32>, vector<8x64xf32> -> vector<8x64xf32>
    %103 = vector.broadcast %6 : vector<1x64xf32> to vector<8x64xf32>
    %104 = arith.addf %102, %103 : vector<8x64xf32>
    %cst_30 = arith.constant 5.000000e-01 : f32
    %105 = vector.broadcast %cst_30 : f32 to vector<8x64xf32>
    %106 = arith.mulf %105, %104 : vector<8x64xf32>
    %cst_31 = arith.constant 0.707106769 : f32
    %107 = vector.broadcast %cst_31 : f32 to vector<8x64xf32>
    %108 = arith.mulf %104, %107 : vector<8x64xf32>
    %109 = math.erf %108 : vector<8x64xf32>
    %cst_32 = arith.constant 1.000000e+00 : f32
    %110 = vector.broadcast %cst_32 : f32 to vector<8x64xf32>
    %111 = arith.addf %110, %109 : vector<8x64xf32>
    %112 = arith.mulf %106, %111 : vector<8x64xf32>
    %cst_33 = arith.constant dense<0.000000e+00> : vector<8x32xf32>
    %113 = tpu.matmul %112, %18, %cst_33 {dimension_numbers = #tpu.dot_dimension_numbers<[1], [0], [0], [1], [0, 0, 1, 1], [], []>} : vector<8x64xf32>, vector<64x32xf32>, vector<8x32xf32> -> vector<8x32xf32>
    %114 = vector.shape_cast %32 : vector<32xf32> to vector<1x32xf32>
    %115 = vector.broadcast %114 : vector<1x32xf32> to vector<8x32xf32>
    %116 = arith.addf %113, %115 : vector<8x32xf32>
    %117 = arith.addf %75, %116 : vector<8x32xf32>
    %c1_i32 = arith.constant 1 : i32
    %118 = arith.index_cast %c1_i32 : i32 to index
    %c0_34 = arith.constant 0 : index
    %c0_35 = arith.constant 0 : index
    %119 = vector.load %arg2[%118, %c0_34, %c0_35] : memref<2x7x32xf32, #tpu.memory_space<vmem>>, vector<1x7x32xf32>
    %120 = vector.shape_cast %119 : vector<1x7x32xf32> to vector<7x32xf32>
    %121 = arith.index_cast %c1_i32 : i32 to index
    %c0_36 = arith.constant 0 : index
    %c0_37 = arith.constant 0 : index
    %122 = vector.load %arg3[%121, %c0_36, %c0_37] : memref<2x1x64xf32, #tpu.memory_space<vmem>>, vector<1x1x64xf32>
    %123 = vector.shape_cast %122 : vector<1x1x64xf32> to vector<1x64xf32>
    %124 = arith.index_cast %c1_i32 : i32 to index
    %c0_38 = arith.constant 0 : index
    %c0_39 = arith.constant 0 : index
    %125 = vector.load %arg4[%124, %c0_38, %c0_39] : memref<2x32x32xf32, #tpu.memory_space<vmem>>, vector<1x32x32xf32>
    %126 = vector.shape_cast %125 : vector<1x32x32xf32> to vector<32x32xf32>
    %127 = arith.index_cast %c1_i32 : i32 to index
    %c0_40 = arith.constant 0 : index
    %c0_41 = arith.constant 0 : index
    %128 = vector.load %arg5[%127, %c0_40, %c0_41] : memref<2x32x32xf32, #tpu.memory_space<vmem>>, vector<1x32x32xf32>
    %129 = vector.shape_cast %128 : vector<1x32x32xf32> to vector<32x32xf32>
    %130 = arith.index_cast %c1_i32 : i32 to index
    %c0_42 = arith.constant 0 : index
    %c0_43 = arith.constant 0 : index
    %131 = vector.load %arg6[%130, %c0_42, %c0_43] : memref<2x32x64xf32, #tpu.memory_space<vmem>>, vector<1x32x64xf32>
    %132 = vector.shape_cast %131 : vector<1x32x64xf32> to vector<32x64xf32>
    %133 = arith.index_cast %c1_i32 : i32 to index
    %c0_44 = arith.constant 0 : index
    %c0_45 = arith.constant 0 : index
    %134 = vector.load %arg7[%133, %c0_44, %c0_45] : memref<2x64x32xf32, #tpu.memory_space<vmem>>, vector<1x64x32xf32>
    %135 = vector.shape_cast %134 : vector<1x64x32xf32> to vector<64x32xf32>
    %136 = vector.extract_strided_slice %120 {offsets = [0, 0], sizes = [1, 32], strides = [1, 1]} : vector<7x32xf32> to vector<1x32xf32>
    %137 = vector.shape_cast %136 : vector<1x32xf32> to vector<32xf32>
    %138 = vector.extract_strided_slice %120 {offsets = [1, 0], sizes = [1, 32], strides = [1, 1]} : vector<7x32xf32> to vector<1x32xf32>
    %139 = vector.shape_cast %138 : vector<1x32xf32> to vector<32xf32>
    %140 = vector.extract_strided_slice %120 {offsets = [2, 0], sizes = [1, 32], strides = [1, 1]} : vector<7x32xf32> to vector<1x32xf32>
    %141 = vector.shape_cast %140 : vector<1x32xf32> to vector<32xf32>
    %142 = vector.extract_strided_slice %120 {offsets = [3, 0], sizes = [1, 32], strides = [1, 1]} : vector<7x32xf32> to vector<1x32xf32>
    %143 = vector.shape_cast %142 : vector<1x32xf32> to vector<32xf32>
    %144 = vector.extract_strided_slice %120 {offsets = [4, 0], sizes = [1, 32], strides = [1, 1]} : vector<7x32xf32> to vector<1x32xf32>
    %145 = vector.shape_cast %144 : vector<1x32xf32> to vector<32xf32>
    %146 = vector.extract_strided_slice %120 {offsets = [5, 0], sizes = [1, 32], strides = [1, 1]} : vector<7x32xf32> to vector<1x32xf32>
    %147 = vector.shape_cast %146 : vector<1x32xf32> to vector<32xf32>
    %148 = vector.extract_strided_slice %120 {offsets = [6, 0], sizes = [1, 32], strides = [1, 1]} : vector<7x32xf32> to vector<1x32xf32>
    %149 = vector.shape_cast %148 : vector<1x32xf32> to vector<32xf32>
    %cst_46 = arith.constant dense<0.000000e+00> : vector<8xf32>
    %150 = vector.multi_reduction <add>, %117, %cst_46 [1] : vector<8x32xf32> to vector<8xf32>
    %151 = vector.shape_cast %150 : vector<8xf32> to vector<8x1xf32>
    %cst_47 = arith.constant 3.200000e+01 : f32
    %152 = vector.broadcast %cst_47 : f32 to vector<8x1xf32>
    %153 = arith.divf %151, %152 : vector<8x1xf32>
    %154 = arith.mulf %117, %117 : vector<8x32xf32>
    %cst_48 = arith.constant dense<0.000000e+00> : vector<8xf32>
    %155 = vector.multi_reduction <add>, %154, %cst_48 [1] : vector<8x32xf32> to vector<8xf32>
    %156 = vector.shape_cast %155 : vector<8xf32> to vector<8x1xf32>
    %cst_49 = arith.constant 3.200000e+01 : f32
    %157 = vector.broadcast %cst_49 : f32 to vector<8x1xf32>
    %158 = arith.divf %156, %157 : vector<8x1xf32>
    %159 = arith.mulf %153, %153 : vector<8x1xf32>
    %160 = arith.subf %158, %159 : vector<8x1xf32>
    %cst_50 = arith.constant 0.000000e+00 : f32
    %161 = vector.broadcast %cst_50 : f32 to vector<8x1xf32>
    %162 = arith.maximumf %160, %161 : vector<8x1xf32>
    %163 = vector.broadcast %153 : vector<8x1xf32> to vector<8x32xf32>
    %164 = arith.subf %117, %163 : vector<8x32xf32>
    %cst_51 = arith.constant 9.99999974E-6 : f32
    %165 = vector.broadcast %cst_51 : f32 to vector<8x1xf32>
    %166 = arith.addf %162, %165 : vector<8x1xf32>
    %167 = math.rsqrt %166 : vector<8x1xf32>
    %168 = vector.broadcast %167 : vector<8x1xf32> to vector<8x32xf32>
    %169 = arith.mulf %164, %168 : vector<8x32xf32>
    %170 = vector.shape_cast %137 : vector<32xf32> to vector<1x32xf32>
    %171 = vector.broadcast %170 : vector<1x32xf32> to vector<8x32xf32>
    %172 = arith.mulf %169, %171 : vector<8x32xf32>
    %173 = vector.shape_cast %139 : vector<32xf32> to vector<1x32xf32>
    %174 = vector.broadcast %173 : vector<1x32xf32> to vector<8x32xf32>
    %175 = arith.addf %172, %174 : vector<8x32xf32>
    %cst_52 = arith.constant dense<0.000000e+00> : vector<8x32xf32>
    %176 = tpu.matmul %175, %126, %cst_52 {dimension_numbers = #tpu.dot_dimension_numbers<[1], [0], [0], [1], [0, 0, 1, 1], [], []>} : vector<8x32xf32>, vector<32x32xf32>, vector<8x32xf32> -> vector<8x32xf32>
    %177 = vector.shape_cast %141 : vector<32xf32> to vector<1x32xf32>
    %178 = vector.broadcast %177 : vector<1x32xf32> to vector<8x32xf32>
    %179 = arith.addf %176, %178 : vector<8x32xf32>
    %cst_53 = arith.constant 5.000000e-01 : f32
    %180 = vector.broadcast %cst_53 : f32 to vector<8x32xf32>
    %181 = arith.mulf %180, %179 : vector<8x32xf32>
    %cst_54 = arith.constant 0.707106769 : f32
    %182 = vector.broadcast %cst_54 : f32 to vector<8x32xf32>
    %183 = arith.mulf %179, %182 : vector<8x32xf32>
    %184 = math.erf %183 : vector<8x32xf32>
    %cst_55 = arith.constant 1.000000e+00 : f32
    %185 = vector.broadcast %cst_55 : f32 to vector<8x32xf32>
    %186 = arith.addf %185, %184 : vector<8x32xf32>
    %187 = arith.mulf %181, %186 : vector<8x32xf32>
    %cst_56 = arith.constant dense<0.000000e+00> : vector<8x32xf32>
    %188 = tpu.matmul %187, %129, %cst_56 {dimension_numbers = #tpu.dot_dimension_numbers<[1], [0], [0], [1], [0, 0, 1, 1], [], []>} : vector<8x32xf32>, vector<32x32xf32>, vector<8x32xf32> -> vector<8x32xf32>
    %189 = vector.shape_cast %143 : vector<32xf32> to vector<1x32xf32>
    %190 = vector.broadcast %189 : vector<1x32xf32> to vector<8x32xf32>
    %191 = arith.addf %188, %190 : vector<8x32xf32>
    %192 = arith.addf %117, %191 : vector<8x32xf32>
    %cst_57 = arith.constant dense<0.000000e+00> : vector<8xf32>
    %193 = vector.multi_reduction <add>, %192, %cst_57 [1] : vector<8x32xf32> to vector<8xf32>
    %194 = vector.shape_cast %193 : vector<8xf32> to vector<8x1xf32>
    %cst_58 = arith.constant 3.200000e+01 : f32
    %195 = vector.broadcast %cst_58 : f32 to vector<8x1xf32>
    %196 = arith.divf %194, %195 : vector<8x1xf32>
    %197 = arith.mulf %192, %192 : vector<8x32xf32>
    %cst_59 = arith.constant dense<0.000000e+00> : vector<8xf32>
    %198 = vector.multi_reduction <add>, %197, %cst_59 [1] : vector<8x32xf32> to vector<8xf32>
    %199 = vector.shape_cast %198 : vector<8xf32> to vector<8x1xf32>
    %cst_60 = arith.constant 3.200000e+01 : f32
    %200 = vector.broadcast %cst_60 : f32 to vector<8x1xf32>
    %201 = arith.divf %199, %200 : vector<8x1xf32>
    %202 = arith.mulf %196, %196 : vector<8x1xf32>
    %203 = arith.subf %201, %202 : vector<8x1xf32>
    %cst_61 = arith.constant 0.000000e+00 : f32
    %204 = vector.broadcast %cst_61 : f32 to vector<8x1xf32>
    %205 = arith.maximumf %203, %204 : vector<8x1xf32>
    %206 = vector.broadcast %196 : vector<8x1xf32> to vector<8x32xf32>
    %207 = arith.subf %192, %206 : vector<8x32xf32>
    %cst_62 = arith.constant 9.99999974E-6 : f32
    %208 = vector.broadcast %cst_62 : f32 to vector<8x1xf32>
    %209 = arith.addf %205, %208 : vector<8x1xf32>
    %210 = math.rsqrt %209 : vector<8x1xf32>
    %211 = vector.broadcast %210 : vector<8x1xf32> to vector<8x32xf32>
    %212 = arith.mulf %207, %211 : vector<8x32xf32>
    %213 = vector.shape_cast %145 : vector<32xf32> to vector<1x32xf32>
    %214 = vector.broadcast %213 : vector<1x32xf32> to vector<8x32xf32>
    %215 = arith.mulf %212, %214 : vector<8x32xf32>
    %216 = vector.shape_cast %147 : vector<32xf32> to vector<1x32xf32>
    %217 = vector.broadcast %216 : vector<1x32xf32> to vector<8x32xf32>
    %218 = arith.addf %215, %217 : vector<8x32xf32>
    %cst_63 = arith.constant dense<0.000000e+00> : vector<8x64xf32>
    %219 = tpu.matmul %218, %132, %cst_63 {dimension_numbers = #tpu.dot_dimension_numbers<[1], [0], [0], [1], [0, 0, 1, 1], [], []>} : vector<8x32xf32>, vector<32x64xf32>, vector<8x64xf32> -> vector<8x64xf32>
    %220 = vector.broadcast %123 : vector<1x64xf32> to vector<8x64xf32>
    %221 = arith.addf %219, %220 : vector<8x64xf32>
    %cst_64 = arith.constant 5.000000e-01 : f32
    %222 = vector.broadcast %cst_64 : f32 to vector<8x64xf32>
    %223 = arith.mulf %222, %221 : vector<8x64xf32>
    %cst_65 = arith.constant 0.707106769 : f32
    %224 = vector.broadcast %cst_65 : f32 to vector<8x64xf32>
    %225 = arith.mulf %221, %224 : vector<8x64xf32>
    %226 = math.erf %225 : vector<8x64xf32>
    %cst_66 = arith.constant 1.000000e+00 : f32
    %227 = vector.broadcast %cst_66 : f32 to vector<8x64xf32>
    %228 = arith.addf %227, %226 : vector<8x64xf32>
    %229 = arith.mulf %223, %228 : vector<8x64xf32>
    %cst_67 = arith.constant dense<0.000000e+00> : vector<8x32xf32>
    %230 = tpu.matmul %229, %135, %cst_67 {dimension_numbers = #tpu.dot_dimension_numbers<[1], [0], [0], [1], [0, 0, 1, 1], [], []>} : vector<8x64xf32>, vector<64x32xf32>, vector<8x32xf32> -> vector<8x32xf32>
    %231 = vector.shape_cast %149 : vector<32xf32> to vector<1x32xf32>
    %232 = vector.broadcast %231 : vector<1x32xf32> to vector<8x32xf32>
    %233 = arith.addf %230, %232 : vector<8x32xf32>
    %234 = arith.addf %192, %233 : vector<8x32xf32>
    %c2_i32 = arith.constant 2 : i32
    %c0_68 = arith.constant 0 : index
    %c0_69 = arith.constant 0 : index
    %235 = vector.load %arg8[%c0_68, %c0_69] : memref<8x32xf32, #tpu.memory_space<vmem>>, vector<8x32xf32>
    tpu.vector_store %arg8[%c0_68, %c0_69], %234 {strides = array<i32>} : memref<8x32xf32, #tpu.memory_space<vmem>>, vector<8x32xf32>,
    return
  }
  func.func @transform_0(%arg0: i32) -> (i32, i32) {
    %c0_i32 = arith.constant 0 : i32
    %c0_i32_0 = arith.constant 0 : i32
    return %arg0, %c0_i32 : i32, i32
  }
  func.func @transform_1(%arg0: i32) -> (i32, i32, i32) {
    %c0_i32 = arith.constant 0 : i32
    %c0_i32_0 = arith.constant 0 : i32
    %c0_i32_1 = arith.constant 0 : i32
    %c0_i32_2 = arith.constant 0 : i32
    return %c0_i32, %c0_i32_0, %c0_i32_1 : i32, i32, i32
  }
  func.func @transform_2(%arg0: i32) -> (i32, i32, i32) {
    %c0_i32 = arith.constant 0 : i32
    %c0_i32_0 = arith.constant 0 : i32
    %c0_i32_1 = arith.constant 0 : i32
    %c0_i32_2 = arith.constant 0 : i32
    return %c0_i32, %c0_i32_0, %c0_i32_1 : i32, i32, i32
  }
  func.func @transform_3(%arg0: i32) -> (i32, i32, i32) {
    %c0_i32 = arith.constant 0 : i32
    %c0_i32_0 = arith.constant 0 : i32
    %c0_i32_1 = arith.constant 0 : i32
    %c0_i32_2 = arith.constant 0 : i32
    return %c0_i32, %c0_i32_0, %c0_i32_1 : i32, i32, i32
  }
  func.func @transform_4(%arg0: i32) -> (i32, i32, i32) {
    %c0_i32 = arith.constant 0 : i32
    %c0_i32_0 = arith.constant 0 : i32
    %c0_i32_1 = arith.constant 0 : i32
    %c0_i32_2 = arith.constant 0 : i32
    return %c0_i32, %c0_i32_0, %c0_i32_1 : i32, i32, i32
  }
  func.func @transform_5(%arg0: i32) -> (i32, i32, i32) {
    %c0_i32 = arith.constant 0 : i32
    %c0_i32_0 = arith.constant 0 : i32
    %c0_i32_1 = arith.constant 0 : i32
    %c0_i32_2 = arith.constant 0 : i32
    return %c0_i32, %c0_i32_0, %c0_i32_1 : i32, i32, i32
  }
  func.func @transform_6(%arg0: i32) -> (i32, i32, i32) {
    %c0_i32 = arith.constant 0 : i32
    %c0_i32_0 = arith.constant 0 : i32
    %c0_i32_1 = arith.constant 0 : i32
    %c0_i32_2 = arith.constant 0 : i32
    return %c0_i32, %c0_i32_0, %c0_i32_1 : i32, i32, i32
  }
  func.func @transform_7(%arg0: i32) -> (i32, i32) {
    %c0_i32 = arith.constant 0 : i32
    %c0_i32_0 = arith.constant 0 : i32
    return %arg0, %c0_i32 : i32, i32
  }
}

</mosaic_0001>

<bundles_post_ra>
// kernel: tpu_custom_call.1
= control target key start
LH: loop header
LB: loop body
LE: loop exit
PB: predicated region body
PF: predicated region fallthrough
CT: control target
= control target key end

     0   :  { %12 = vsyncpa [#allocation3], 0  ;;  %s1881_s0 = inlined_call_operand.vmem [shape: f32[16,32], index: 0, kind: input, shape index: {}]   ;;  %s1882_s1 = inlined_call_operand.vmem [shape: f32[2,7,32], index: 1, kind: input, shape index: {}]   ;;  %s1883_s2 = inlined_call_operand.vmem [shape: f32[2,1,64], index: 2, kind: input, shape index: {}]   ;;  %s1884_s3 = inlined_call_operand.vmem [shape: f32[2,32,32], index: 3, kind: input, shape index: {}]   ;;  %s1885_s4 = inlined_call_operand.vmem [shape: f32[2,32,32], index: 4, kind: input, shape index: {}]   ;;  %s1886_s5 = inlined_call_operand.vmem [shape: f32[2,32,64], index: 5, kind: input, shape index: {}]   ;;  %s1887_s6 = inlined_call_operand.vmem [shape: f32[2,64,32], index: 6, kind: input, shape index: {}]   ;;  %s1888_s7 = inlined_call_operand.hbm [shape: f32[16,32], index: 7, kind: output, shape index: {}]  }
   0x1   :  { %14 = vsyncpa [#allocation3 + $0x1], 0  ;;  %s1506_s24 = smov 0   ;;  %s1508_s25 = smov 0  }
   0x2   :  { %s1510_s26 = smov 0   ;;  %s1512_s27 = smov 0  }
   0x3 LB: > { %s1527_s28 = sadd.s32 4294967295, %s1461_s27   ;;  %s1150_s29 = sadd.s32 4294967294, %s1461_s27   ;;  %s1461_s27 = sphi %s1512_s27, %s1894_s27   ;;  %s1457_s26 = sphi %s1510_s26, %s1893_s26   ;;  %s1453_s25 = sphi %s1508_s25, %s1892_s25   ;;  %s1449_s24 = sphi %s1506_s24, %s1891_s24  }
   0x4   : > { %s1531_s30 = sadd.s32 1, %s1461_s27   ;;  %s179_s8 = sadd.s32 1, %s1457_s26 }
   0x5   : > { %s176_s9 = ssub.s32 %s1461_s27, %s1531_s30  ;;  %p189_p0 = scmp.ne.s32.totalorder %s1457_s26, %s1453_s25 }
   0x6   : > { %p177_p1 = scmp.eq.s32.totalorder %s176_s9, 0  ;;  %p190_p2 = scmp.eq.s32.totalorder %s1527_s28, 1 }
   0x7   : > { %p195_p3 = scmp.ne.s32.totalorder %s1453_s25, %s1449_s24  ;;  %p196_p4 = scmp.eq.s32.totalorder %s1150_s29, 1 }
   0x8   : > { %s1542_s10 = scalar_select %p177_p1, %s1457_s26, %s179_s8  }
   0x9   : > { %p1544_p5 = por %p190_p2, %p189_p0  ;;  %p1548_p6 = por %p196_p4, %p195_p3 }
   0xa   : > { %p1153_p7 = scmp.ge.s32.totalorder %s1461_s27, 1  ;;  %p239_p8 = scmp.lt.s32.totalorder %s1461_s27, 3 }
   0xc   : > { %p240_p9 = pnand %p1153_p7, %p239_p8 }
   0xd   : > { %p270_p10 = scmp.lt.s32.totalorder (!%p240_p9), %s1527_s28, 1  ;;  %s267_s22 = sand.u32 (!%p240_p9), 1, %s1453_s25  }
   0xe   : > { %243 = sbr.rel (%p240_p9) target bundleno = 2365 (0x93d), region = 48  ;;  %s1154_s23 = sshll.u32 (!%p240_p9), %s267_s22, 3 }
   0xf   : > { %s1189_s29 = sshll.u32 (!%p240_p9), %s1527_s28, 7  ;;  %s269_s8 = scalar_lea.vmem (!%p240_p9), [#allocation2], %s1154_s23 }
  0x10   : > { %s1091_s9 = sshll.u32 (!%p240_p9), %s269_s8, 4  ;;  %s1089_s15 = scalar_lea.hbm (!%p240_p9), %s1888_s7, %s1189_s29  ;;  %s1092_s9 = int_to_ptr.vmem [resolvable:$true] %s1091_s9 }
  0x11   : > { %s1078_s16 = scalar_lea.sflag (!%p240_p9), [#allocation3], %s267_s22 }
  0x13   : > { %s271_s13 = scalar_select %p270_p10, %s1527_s28, 1  ;;  %vm297_vm0 = vcmask 261120   ;;  %v280_v4 = vld [vmem:[%s1884_s3 + $0x18] sm:$0xff]  ;;  %v1463_v5 = vmov 0.0   ;;  %v279_v6 = vld [vmem:[%s1884_s3 + $0x10] sm:$0xff]  ;;  %vm1464_vm1 = vmmov 0   ;;  %v315_v17 = vlaneseq }
  0x14   : > { %1240 = vmatprep.subr.mxu1 %v1463_v5  ;;  %1248 = vmatprep.mubr.msk.f32.mxu1 %vm1464_vm1, %v1463_v5  ;;  %v278_v7 = vld [vmem:[%s1884_s3 + $0x8] sm:$0xff]  ;;  %v277_v8 = vld [vmem:[%s1884_s3] sm:$0xff]  ;;  %v284_v29 = vld [vmem:[%s1885_s4 + $0x18] sm:$0xff]  ;;  %vm599_vm2 = vcmask 523264   ;;  %s1465_s28 = smov [#allocation2]  }
  0x15   : > { %s1155_s14 = sshll.u32 %s271_s13, 3  ;;  %1241 = vmatpush3.msra.mxu1 %v280_v4  ;;  %1262 = vmatprep.subr.mxu0 %v1463_v5  ;;  %v1588_v18 = vshrl.u32 %v315_v17, 7  ;;  %v1594_v20 = vld [vmem:[%s1882_s1] sm:$0x7f]  ;;  %v283_v30 = vld [vmem:[%s1885_s4 + $0x10] sm:$0xff]  ;;  %v282_v31 = vld [vmem:[%s1885_s4 + $0x8] sm:$0xff] }
  0x16   : > { %s273_s17 = scalar_lea.vmem %s1881_s0, %s1155_s14  ;;  %1242 = vmatprep.subr.mxu1 %v1463_v5  ;;  %1270 = vmatprep.mubr.msk.f32.mxu0 %vm1464_vm1, %v1463_v5  ;;  %v281_v32 = vld [vmem:[%s1885_s4] sm:$0xff]  ;;  %v288_v52 = vld [vmem:[%s1886_s5 + $0x18] sm:$0xff]  ;;  %v287_v53 = vld [vmem:[%s1886_s5 + $0x10] sm:$0xff]  ;;  %s1405_s18 = sshll.u32 %s1465_s28, 4  ;;  %s1406_s18 = int_to_ptr.vmem [resolvable:$false] %s1405_s18 }
  0x17   : > { %v1559_v0 = vld [vmem:[%s273_s17] sm:$0xff]  ;;  %1243 = vmatpush3.msra.mxu1 %v279_v6  ;;  %v317_v19 = vsub.s32 0, %v1588_v18  ;;  %v322_v21 = vsub.s32 1, %v1588_v18  ;;  %v327_v33 = vsub.s32 2, %v1588_v18  ;;  %v409_v43 = vsub.s32 3, %v1588_v18  ;;  %1263 = vmatpush3.msra.mxu0 %v288_v52  ;;  %v286_v54 = vld [vmem:[%s1886_s5 + $0x8] sm:$0xff]  ;;  %p1408_p0 = scmp.lt.s32.totalorder %s1092_s9, %s1406_s18 }
  0x18   : > { %v298_v1 = vsel %vm297_vm0, %v1559_v0, 0.0  ;;  %v303_v2 = vmul.f32 %v1559_v0, %v1559_v0  ;;  %1244 = vmatprep.subr.mxu1 %v1463_v5  ;;  %1264 = vmatprep.subr.mxu0 %v1463_v5  ;;  %v285_v55 = vld [vmem:[%s1886_s5] sm:$0xff]  ;;  %s1401_s17 = scalar_lea.vmem %s1092_s9, 128  ;;  %s1407_s19 = scalar_lea.vmem %s1406_s18, 256 }
  0x19   : > { %299 = vadd.xlane.f32.xlu0 %v298_v1  ;;  %1245 = vmatpush3.msra.mxu1 %v278_v7  ;;  %v318_v23 = vrot.slane %v1594_v20, %v317_v19  ;;  %v323_v26 = vrot.slane %v1594_v20, %v322_v21  ;;  %v328_v34 = vrot.slane %v1594_v20, %v327_v33  ;;  %v508_v1 = vsub.s32 5, %v1588_v18  ;;  %v289_v17 = vld [vmem:[%s1887_s6] sm:$0xff]  ;;  %p1402_p11 = scmp.ne.s32.totalorder %s1092_s9, %s1401_s17  ;;  %p1409_p1 = scmp.lt.s32.totalorder %s1407_s19, %s1401_s17 }
  0x1a   : > { %v304_v3 = vsel %vm297_vm0, %v303_v2, 0.0  ;;  %1246 = vmatprep.subr.mxu1 %v1463_v5  ;;  %v410_v44 = vrot.slane %v1594_v20, %v409_v43  ;;  %1265 = vmatpush3.msra.mxu0 %v287_v53  ;;  %v1739_v53 = vld [vmem:[%s1882_s1 + $0x8] sm:$0x7f] }
  0x1b   : > { %1247 = vmatpush3.msra.mxu1 %v277_v8  ;;  %1266 = vmatprep.subr.mxu0 %v1463_v5  ;;  %v509_v7 = vrot.slane %v1594_v20, %v508_v1  ;;  %p1403_p12 = pnand %p1402_p11, %p1544_p5  ;;  %p1410_p2 = por %p1409_p1, %p1408_p0 }
  0x1c   : > { %1251 = vmatprep.subr.mxu1 %v1463_v5  ;;  %1267 = vmatpush3.msra.mxu0 %v286_v54  ;;  %v721_v54 = vrot.slane %v1739_v53, %v317_v19  ;;  %v1169_v19 = vld [vmem:[%s1885_s4 + $0x30] sm:$0xff] }
  0x1d   : > { %305 = vadd.xlane.f32.xlu0 %v304_v3  ;;  %1268 = vmatprep.subr.mxu0 %v1463_v5  ;;  %p1404_p13 = pneg %p1403_p12 }
  0x1e   : > { %1269 = vmatpush3.msra.mxu0 %v285_v55 }
  0x1f   : > { %1292 = vmatprep.subr.mxu0 %v1463_v5  ;;  %p1411_p3 = pnand %p1410_p2, %p1404_p13 }
  0xa2   : > { %v300_v9 = vpop.xlane.xlu0 %299 }
  0xa3   : > { %v302_v10 = vmul.f32 0.03125, %v300_v9 }
  0xa5   : > { %v308_v12 = vmul.f32 %v302_v10, %v302_v10  ;;  %v311_v22 = vsub.f32 %v1559_v0, %v302_v10  ;;  %v296_v10 = vld [vmem:[%s1887_s6 + $0x38] sm:$0xff] }
  0xa6   : > { %v306_v11 = vpop.xlane.xlu0 %305 }
  0xa7   : > { %v307_v13 = vmul.f32 0.03125, %v306_v11  ;;  %v295_v11 = vld [vmem:[%s1887_s6 + $0x30] sm:$0xff] }
  0xa9   : > { %v309_v14 = vsub.f32 %v307_v13, %v308_v12  ;;  %v294_v12 = vld [vmem:[%s1887_s6 + $0x28] sm:$0xff]  ;;  %v293_v13 = vld [vmem:[%s1887_s6 + $0x20] sm:$0xff] }
  0xab   : > { %v310_v15 = vmax.f32 %v309_v14, 0.0  ;;  %v292_v14 = vld [vmem:[%s1887_s6 + $0x18] sm:$0xff] }
  0xad   : > { %v312_v16 = vadd.f32 1e-05, %v310_v15  ;;  %v291_v15 = vld [vmem:[%s1887_s6 + $0x10] sm:$0xff] }
  0xaf   : > { %1385 = vrsqrt.f32 %v312_v16  ;;  %v290_v16 = vld [vmem:[%s1887_s6 + $0x8] sm:$0xff] }
  0xbc   : > { %v1386_v24 = vpop.eup %1385 }
  0xbd   : > { %v314_v25 = vmul.f32 %v1386_v24, %v311_v22  ;;  %v1158_v22 = vld [vmem:[%s1883_s2] ss:$0 sm:$0xff] }
  0xbf   : > { %v319_v27 = vmul.f32 %v318_v23, %v314_v25 }
  0xc1   : > { %v324_v28 = vadd.f32 %v323_v26, %v319_v27 }
  0xc3   : > { %1249 = vmatmul.mubr.msk.f32.vlgmr.msra.gmra.mxu1 %vm297_vm0, %v324_v28 }
  0xc4   : > { %1259 = vmatprep.mubr.msk.f32.mxu1 %vm1464_vm1, %v1463_v5  ;;  %1252 = vmatpush3.msra.mxu1 %v284_v29 }
  0xc5   : > { %1253 = vmatprep.subr.mxu1 %v1463_v5 }
  0xc6   : > { %1254 = vmatpush3.msra.mxu1 %v283_v30 }
  0xc7   : > { %1255 = vmatprep.subr.mxu1 %v1463_v5 }
  0xc8   : > { %1256 = vmatpush3.msra.mxu1 %v282_v31  ;;  %v597_v31 = vsub.s32 6, %v1588_v18 }
  0xc9   : > { %1257 = vmatprep.subr.mxu1 %v1463_v5 }
  0xca   : > { %1258 = vmatpush3.msra.mxu1 %v281_v32  ;;  %v598_v32 = vrot.slane %v1594_v20, %v597_v31 }
  0xcb   : > { %1273 = vmatprep.subr.mxu1 %v1463_v5 }
 0x183   : > { %v398_v35 = vpop.f32.mrf.mxu1 }
 0x184   : > { %v399_v36 = vadd.f32 %v398_v35, %v328_v34 }
 0x185   : > { %v1250_v37 = vpop.f32.mrf.mxu1 }
 0x186   : > { %v403_v38 = vmul.f32 0.70710677, %v399_v36  ;;  %v402_v40 = vmul.f32 0.5, %v399_v36 }
 0x188   : > { %1387 = verf.f32 %v403_v38 }
 0x195   : > { %v1388_v39 = vpop.eup %1387 }
 0x196   : > { %v405_v41 = vadd.f32 1.0, %v1388_v39 }
 0x198   : > { %v406_v42 = vmul.f32 %v405_v41, %v402_v40  ;;  %v1165_v41 = vld [vmem:[%s1884_s3 + $0x30] sm:$0xff] }
 0x19a   : > { %1260 = vmatmul.mubr.msk.f32.vlgmr.msra.gmra.mxu1 %vm297_vm0, %v406_v42  ;;  %v1164_v42 = vld [vmem:[%s1884_s3 + $0x28] sm:$0xff] }
 0x19b   : > { %1289 = vmatprep.mubr.msk.f32.mxu1 %vm1464_vm1, %v1463_v5  ;;  %1274 = vmatpush3.msra.mxu1 %v296_v10 }
 0x19c   : > { %1275 = vmatprep.subr.mxu1 %v1463_v5 }
 0x19d   : > { %1276 = vmatpush3.msra.mxu1 %v295_v11  ;;  %v813_v11 = vrot.slane %v1739_v53, %v409_v43  ;;  %v1174_v43 = vld [vmem:[%s1886_s5 + $0x38] sm:$0xff] }
 0x19e   : > { %1277 = vmatprep.subr.mxu1 %v1463_v5 }
 0x19f   : > { %1278 = vmatpush3.msra.mxu1 %v294_v12 }
 0x1a0   : > { %1279 = vmatprep.subr.mxu1 %v1463_v5 }
 0x1a1   : > { %1280 = vmatpush3.msra.mxu1 %v293_v13 }
 0x1a2   : > { %1281 = vmatprep.subr.mxu1 %v1463_v5 }
 0x1a3   : > { %1282 = vmatpush3.msra.mxu1 %v292_v14 }
 0x1a4   : > { %1283 = vmatprep.subr.mxu1 %v1463_v5 }
 0x1a5   : > { %1284 = vmatpush3.msra.mxu1 %v291_v15 }
 0x1a6   : > { %1285 = vmatprep.subr.mxu1 %v1463_v5 }
 0x1a7   : > { %1286 = vmatpush3.msra.mxu1 %v290_v16 }
 0x1a8   : > { %1287 = vmatprep.subr.mxu1 %v1463_v5 }
 0x1a9   : > { %1288 = vmatpush3.msra.mxu1 %v289_v17 }
 0x1aa   : > { %1314 = vmatprep.subr.mxu1 %v1463_v5 }
 0x25a   : > { %v480_v45 = vpop.f32.mrf.mxu1 }
 0x25b   : > { %v481_v46 = vadd.f32 %v480_v45, %v410_v44  ;;  %v1163_v44 = vld [vmem:[%s1884_s3 + $0x20] sm:$0xff] }
 0x25c   : > { %v1261_v47 = vpop.f32.mrf.mxu1 }
 0x25d   : > { %v1635_v48 = vadd.f32 %v481_v46, %v1559_v0  ;;  %v503_v0 = vsub.s32 4, %v1588_v18 }
 0x25f   : > { %v485_v49 = vsel %vm297_vm0, %v1635_v48, 0.0  ;;  %v489_v50 = vmul.f32 %v1635_v48, %v1635_v48  ;;  %v504_v3 = vrot.slane %v1594_v20, %v503_v0  ;;  %v1166_v20 = vld [vmem:[%s1884_s3 + $0x38] sm:$0xff] }
 0x260   : > { %486 = vadd.xlane.f32.xlu1 %v485_v49 }
 0x261   : > { %v490_v51 = vsel %vm297_vm0, %v489_v50, 0.0 }
 0x264   : > { %491 = vadd.xlane.f32.xlu1 %v490_v51 }
 0x2e9   : > { %v487_v56 = vpop.xlane.xlu1 %486 }
 0x2ea   : > { %v488_v57 = vmul.f32 0.03125, %v487_v56 }
 0x2ec   : > { %v494_v59 = vmul.f32 %v488_v57, %v488_v57  ;;  %v497_v2 = vsub.f32 %v1635_v48, %v488_v57  ;;  %v726_v57 = vrot.slane %v1739_v53, %v322_v21  ;;  %v1168_v21 = vld [vmem:[%s1885_s4 + $0x28] sm:$0xff] }
 0x2ed   : > { %v492_v58 = vpop.xlane.xlu1 %491 }
 0x2ee   : > { %v493_v60 = vmul.f32 0.03125, %v492_v58 }
 0x2f0   : > { %v495_v61 = vsub.f32 %v493_v60, %v494_v59 }
 0x2f2   : > { %v496_v62 = vmax.f32 %v495_v61, 0.0  ;;  %v1170_v61 = vld [vmem:[%s1885_s4 + $0x38] sm:$0xff] }
 0x2f4   : > { %v498_v63 = vadd.f32 1e-05, %v496_v62  ;;  %v1167_v62 = vld [vmem:[%s1885_s4 + $0x20] sm:$0xff] }
 0x2f6   : > { %1389 = vrsqrt.f32 %v498_v63  ;;  %v731_v63 = vrot.slane %v1739_v53, %v327_v33 }
 0x303   : > { %v1390_v4 = vpop.eup %1389 }
 0x304   : > { %v500_v6 = vmul.f32 %v1390_v4, %v497_v2 }
 0x306   : > { %v505_v8 = vmul.f32 %v504_v3, %v500_v6 }
 0x308   : > { %v510_v9 = vadd.f32 %v509_v7, %v505_v8 }
 0x30a   : > { %1271 = vmatmul.mubr.msk.f32.vlgmr.msra.gmra.mxu0 %vm297_vm0, %v510_v9 }
 0x30b   : > { %1300 = vmatprep.mubr.msk.f32.mxu0 %vm1464_vm1, %v1463_v5  ;;  %1293 = vmatpush3.msra.mxu0 %v1166_v20 }
 0x30c   : > { %1294 = vmatprep.subr.mxu0 %v1463_v5 }
 0x30d   : > { %1295 = vmatpush3.msra.mxu0 %v1165_v41  ;;  %v1182_v41 = vld [vmem:[%s1887_s6 + $0x78] sm:$0xff] }
 0x30e   : > { %1296 = vmatprep.subr.mxu0 %v1463_v5 }
 0x30f   : > { %1297 = vmatpush3.msra.mxu0 %v1164_v42  ;;  %v1179_v42 = vld [vmem:[%s1887_s6 + $0x60] sm:$0xff] }
 0x310   : > { %1298 = vmatprep.subr.mxu0 %v1463_v5 }
 0x311   : > { %1299 = vmatpush3.msra.mxu0 %v1163_v44  ;;  %v1178_v44 = vld [vmem:[%s1887_s6 + $0x58] sm:$0xff] }
 0x312   : > { %1303 = vmatprep.subr.mxu0 %v1463_v5 }
 0x3ca   : > { %v586_v23 = vpop.f32.mrf.mxu0 }
 0x3cb   : > { %v587_v24 = vadd.f32 %v1158_v22, %v586_v23  ;;  %v1173_v22 = vld [vmem:[%s1886_s5 + $0x30] sm:$0xff]  ;;  %v1172_v23 = vld [vmem:[%s1886_s5 + $0x28] sm:$0xff] }
 0x3cc   : > { %v1272_v25 = vpop.f32.mrf.mxu0 }
 0x3cd   : > { %v591_v26 = vmul.f32 0.70710677, %v587_v24  ;;  %v590_v28 = vmul.f32 0.5, %v587_v24  ;;  %v1171_v24 = vld [vmem:[%s1886_s5 + $0x20] sm:$0xff] }
 0x3cf   : > { %1391 = verf.f32 %v591_v26 }
 0x3dc   : > { %v1392_v27 = vpop.eup %1391 }
 0x3dd   : > { %v593_v29 = vadd.f32 1.0, %v1392_v27 }
 0x3df   : > { %v594_v30 = vmul.f32 %v593_v29, %v590_v28 }
 0x3e1   : > { %1290 = vmatmul.mubr.msk.f32.vlgmr.msra.gmra.mxu1 %vm599_vm2, %v594_v30 }
 0x3e2   : > { %1322 = vmatprep.mubr.msk.f32.mxu1 %vm1464_vm1, %v1463_v5  ;;  %1315 = vmatpush3.msra.mxu1 %v1174_v43 }
 0x3e3   : > { %1316 = vmatprep.subr.mxu1 %v1463_v5 }
 0x3e4   : > { %1317 = vmatpush3.msra.mxu1 %v1173_v22 }
 0x3e5   : > { %1318 = vmatprep.subr.mxu1 %v1463_v5 }
 0x3e6   : > { %1319 = vmatpush3.msra.mxu1 %v1172_v23 }
 0x3e7   : > { %1320 = vmatprep.subr.mxu1 %v1463_v5 }
 0x3e8   : > { %1321 = vmatpush3.msra.mxu1 %v1171_v24 }
 0x4a1   : > { %v669_v34 = vpop.f32.mrf.mxu1 }
 0x4a2   : > { %v670_v35 = vadd.f32 %v669_v34, %v598_v32 }
 0x4a3   : > { %v1291_v36 = vpop.f32.mrf.mxu1 }
 0x4a4   : > { %v1713_v37 = vadd.f32 %v670_v35, %v1635_v48  ;;  %v907_v35 = vrot.slane %v1739_v53, %v503_v0  ;;  %v1181_v0 = vld [vmem:[%s1887_s6 + $0x70] sm:$0xff] }
 0x4a6   : > { %v702_v38 = vsel %vm297_vm0, %v1713_v37, 0.0  ;;  %v706_v39 = vmul.f32 %v1713_v37, %v1713_v37 }
 0x4a7   : > { %703 = vadd.xlane.f32.xlu0 %v702_v38  ;;  %v912_v38 = vrot.slane %v1739_v53, %v508_v1  ;;  %v1180_v1 = vld [vmem:[%s1887_s6 + $0x68] sm:$0xff] }
 0x4a8   : > { %v707_v40 = vsel %vm297_vm0, %v706_v39, 0.0 }
 0x4a9   : > { %708 = vadd.xlane.f32.xlu1 %v707_v40 }
 0x530   : > { %v704_v45 = vpop.xlane.xlu0 %703 }
 0x531   : > { %v705_v46 = vmul.f32 0.03125, %v704_v45  ;;  %v1177_v45 = vld [vmem:[%s1887_s6 + $0x50] sm:$0xff] }
 0x532   : > { %v709_v47 = vpop.xlane.xlu1 %708 }
 0x533   : > { %v711_v48 = vmul.f32 %v705_v46, %v705_v46  ;;  %v710_v49 = vmul.f32 0.03125, %v709_v47  ;;  %v714_v55 = vsub.f32 %v1713_v37, %v705_v46  ;;  %v1176_v46 = vld [vmem:[%s1887_s6 + $0x48] sm:$0xff]  ;;  %v1175_v47 = vld [vmem:[%s1887_s6 + $0x40] sm:$0xff] }
 0x535   : > { %v712_v50 = vsub.f32 %v710_v49, %v711_v48  ;;  %v1185_v48 = vld [vmem:[%s1883_s2 + $0x1] ss:$0 sm:$0xff] }
 0x537   : > { %v713_v51 = vmax.f32 %v712_v50, 0.0 }
 0x539   : > { %v715_v52 = vadd.f32 1e-05, %v713_v51 }
 0x53b   : > { %1393 = vrsqrt.f32 %v715_v52 }
 0x548   : > { %v1394_v56 = vpop.eup %1393 }
 0x549   : > { %v717_v58 = vmul.f32 %v1394_v56, %v714_v55 }
 0x54b   : > { %v722_v59 = vmul.f32 %v721_v54, %v717_v58 }
 0x54d   : > { %v727_v60 = vadd.f32 %v726_v57, %v722_v59 }
 0x54f   : > { %1301 = vmatmul.mubr.msk.f32.vlgmr.msra.gmra.mxu0 %vm297_vm0, %v727_v60 }
 0x550   : > { %1311 = vmatprep.mubr.msk.f32.mxu0 %vm1464_vm1, %v1463_v5  ;;  %1304 = vmatpush3.msra.mxu0 %v1170_v61 }
 0x551   : > { %1305 = vmatprep.subr.mxu0 %v1463_v5 }
 0x552   : > { %1306 = vmatpush3.msra.mxu0 %v1169_v19 }
 0x553   : > { %1307 = vmatprep.subr.mxu0 %v1463_v5 }
 0x554   : > { %1308 = vmatpush3.msra.mxu0 %v1168_v21 }
 0x555   : > { %1309 = vmatprep.subr.mxu0 %v1463_v5 }
 0x556   : > { %1310 = vmatpush3.msra.mxu0 %v1167_v62 }
 0x557   : > { %1325 = vmatprep.subr.mxu0 %v1463_v5 }
 0x60f   : > { %v801_v2 = vpop.f32.mrf.mxu0 }
 0x610   : > { %v802_v3 = vadd.f32 %v801_v2, %v731_v63 }
 0x611   : > { %v1302_v4 = vpop.f32.mrf.mxu0 }
 0x612   : > { %v806_v6 = vmul.f32 0.70710677, %v802_v3  ;;  %v805_v8 = vmul.f32 0.5, %v802_v3 }
 0x614   : > { %1395 = verf.f32 %v806_v6 }
 0x621   : > { %v1396_v7 = vpop.eup %1395 }
 0x622   : > { %v808_v9 = vadd.f32 1.0, %v1396_v7 }
 0x624   : > { %v809_v10 = vmul.f32 %v808_v9, %v805_v8 }
 0x626   : > { %1312 = vmatmul.mubr.msk.f32.vlgmr.msra.gmra.mxu0 %vm297_vm0, %v809_v10 }
 0x627   : > { %1341 = vmatprep.mubr.msk.f32.mxu0 %vm1464_vm1, %v1463_v5  ;;  %1326 = vmatpush3.msra.mxu0 %v1182_v41 }
 0x628   : > { %1327 = vmatprep.subr.mxu0 %v1463_v5 }
 0x629   : > { %1328 = vmatpush3.msra.mxu0 %v1181_v0 }
 0x62a   : > { %1329 = vmatprep.subr.mxu0 %v1463_v5 }
 0x62b   : > { %1330 = vmatpush3.msra.mxu0 %v1180_v1 }
 0x62c   : > { %1331 = vmatprep.subr.mxu0 %v1463_v5 }
 0x62d   : > { %1332 = vmatpush3.msra.mxu0 %v1179_v42 }
 0x62e   : > { %1333 = vmatprep.subr.mxu0 %v1463_v5 }
 0x62f   : > { %1334 = vmatpush3.msra.mxu0 %v1178_v44 }
 0x630   : > { %1335 = vmatprep.subr.mxu0 %v1463_v5 }
 0x631   : > { %1336 = vmatpush3.msra.mxu0 %v1177_v45 }
 0x632   : > { %1337 = vmatprep.subr.mxu0 %v1463_v5 }
 0x633   : > { %1338 = vmatpush3.msra.mxu0 %v1176_v46 }
 0x634   : > { %1339 = vmatprep.subr.mxu0 %v1463_v5  ;;  %v1001_v5 = vrot.slane %v1739_v53, %v597_v31 }
 0x635   : > { %1340 = vmatpush3.msra.mxu0 %v1175_v47 }
 0x6e6   : > { %v883_v12 = vpop.f32.mrf.mxu0 }
 0x6e7   : > { %v884_v33 = vadd.f32 %v883_v12, %v813_v11 }
 0x6e8   : > { %v1313_v13 = vpop.f32.mrf.mxu0 }
 0x6e9   : > { %v1777_v14 = vadd.f32 %v884_v33, %v1713_v37 }
 0x6eb   : > { %v888_v15 = vsel %vm297_vm0, %v1777_v14, 0.0  ;;  %v892_v16 = vmul.f32 %v1777_v14, %v1777_v14 }
 0x6ec   : > { %889 = vadd.xlane.f32.xlu0 %v888_v15 }
 0x6ed   : > { %v893_v17 = vsel %vm297_vm0, %v892_v16, 0.0 }
 0x6ee   : > { %894 = vadd.xlane.f32.xlu1 %v893_v17 }
 0x775   : > { %v890_v25 = vpop.xlane.xlu0 %889 }
 0x776   : > { %v891_v26 = vmul.f32 0.03125, %v890_v25 }
 0x777   : > { %v895_v27 = vpop.xlane.xlu1 %894 }
 0x778   : > { %v897_v28 = vmul.f32 %v891_v26, %v891_v26  ;;  %v896_v29 = vmul.f32 0.03125, %v895_v27  ;;  %v900_v36 = vsub.f32 %v1777_v14, %v891_v26 }
 0x77a   : > { %v898_v30 = vsub.f32 %v896_v29, %v897_v28 }
 0x77c   : > { %v899_v32 = vmax.f32 %v898_v30, 0.0 }
 0x77e   : > { %v901_v34 = vadd.f32 1e-05, %v899_v32 }
 0x780   : > { %1397 = vrsqrt.f32 %v901_v34 }
 0x78d   : > { %v1398_v37 = vpop.eup %1397 }
 0x78e   : > { %v903_v39 = vmul.f32 %v1398_v37, %v900_v36 }
 0x790   : > { %v908_v40 = vmul.f32 %v907_v35, %v903_v39 }
 0x792   : > { %v913_v20 = vadd.f32 %v912_v38, %v908_v40 }
 0x794   : > { %1323 = vmatmul.mubr.msk.f32.vlgmr.msra.gmra.mxu1 %vm297_vm0, %v913_v20 }
 0x854   : > { %v989_v49 = vpop.f32.mrf.mxu1 }
 0x855   : > { %v990_v50 = vadd.f32 %v1185_v48, %v989_v49 }
 0x856   : > { %v1324_v51 = vpop.f32.mrf.mxu1 }
 0x857   : > { %v994_v52 = vmul.f32 0.70710677, %v990_v50  ;;  %v993_v55 = vmul.f32 0.5, %v990_v50 }
 0x859   : > { %1399 = verf.f32 %v994_v52 }
 0x866   : > { %v1400_v54 = vpop.eup %1399 }
 0x867   : > { %v996_v56 = vadd.f32 1.0, %v1400_v54 }
 0x869   : > { %v997_v57 = vmul.f32 %v996_v56, %v993_v55 }
 0x86b   : > { %1342 = vmatmul.mubr.msk.f32.vlgmr.msra.gmra.mxu0 %vm599_vm2, %v997_v57 }
 0x92b   : > { %v1071_v58 = vpop.f32.mrf.mxu0 }
 0x92c   : > { %v1072_v59 = vadd.f32 %v1071_v58, %v1001_v5 }
 0x92d   : > { %v1343_v60 = vpop.f32.mrf.mxu0 }
 0x92e   : > { %v1075_v61 = vadd.f32 %v1072_v59, %v1777_v14 }
 0x930   : > { %1076 = vst.msk [vmem:[%s269_s8] sm:$0xff] %vm297_vm0, %v1075_v61 }
 0x931   : > { %1414 = shalt.err (!%p1411_p3)
}
 0x932   : > { %s1415_s20 = scalar_lea.hbm %s1089_s15, 128  ;;  %s1419_s23 = scalar_lea.hbm %s1888_s7, 256 }
 0x933   : > { %p1416_p4 = scmp.ne.s32.totalorder %s1089_s15, %s1415_s20  ;;  %p1420_p9 = scmp.lt.s32.totalorder %s1089_s15, %s1888_s7 }
 0x934   : > { %p1421_p10 = scmp.lt.s32.totalorder %s1419_s23, %s1415_s20 }
 0x935   : > { %p1417_p7 = pnand %p1416_p4, %p1544_p5 }
 0x936   : > { %p1422_p11 = por %p1421_p10, %p1420_p9 }
 0x937   : > { %p1418_p8 = pneg %p1417_p7 }
 0x939   : > { %p1423_p12 = pnand %p1422_p11, %p1418_p8 }
 0x93b   : > { %1426 = shalt.err (!%p1423_p12)
}
 0x93c   : > { %1344 = dma.vmem_to_hbm [thread:$0]  (%p1544_p5), %s1092_s9, 128, %s1089_s15, %s1078_s16  }
 0x93d PF: > { %p1350_p13 = scmp.ge.s32.totalorder %s1461_s27, 2  ;;  %s1103_s13 = sand.u32 1, %s1449_s24  }
 0x93e   : > { %s1104_s14 = scalar_lea.sflag [#allocation3], %s1103_s13 }
 0x93f   : > { %p1347_p0 = pnand %p1350_p13, %p1548_p6 }
 0x941   : > { %p1348_p1 = pneg %p1347_p0 }
 0x943   : > { %1444 = dma.done.wait (%p1348_p1), %s1104_s14, 128  }
 0x944   : > { %1446 = vsyncadd (%p1348_p1), %s1104_s14, 4294967168  ;;  %p17_p2 = scmp.ge.s32.totalorder %s1531_s30, 4   ;;  %s1891_s24 = smov %s1453_s25 }
 0x945   : > { %s1892_s25 = smov %s1457_s26  ;;  %s1893_s26 = smov %s1542_s10 }
 0x946   : > { %s1894_s27 = smov %s1531_s30  ;;  %19 = sbr.rel (!%p17_p2) target bundleno = 3 (0x3), region = 89 }
 0x94b   :  { %1109 = vsyncpa [#allocation3], 1 }
 0x94c   :  { %1111 = vsyncpa [#allocation3 + $0x1], 1 }

</bundles_post_ra>
